<compile_context>
chip_gen: v7x
topology: tpu7x:2x2x1
jax: 0.10.0
libtpu: 0.0.40
codegen_flags: <defaults>
</compile_context>

<pallas_src>
import functools

import jax
import jax.numpy as jnp
from jax.experimental import pallas as pl
from jax.experimental.pallas import tpu as pltpu

LANE = 128
VMEM_LIMIT = 32 * 1024 * 1024  # safe on v5e/v6e/v7x; tiles here are tiny.


def _round_up(x, m):
    return (x + m - 1) // m * m


def _pad2(a, rows, cols):
    return jnp.pad(a, ((0, rows - a.shape[0]), (0, cols - a.shape[1])))


# ---------------------------------------------------------------------------
# Kernel 1: per-row-tile linear transforms
#   H = X @ W_l          (bf16, feeds the aggregation matmul)
#   S = X @ W_r + b      (f32, the root/self path; bias lives on lin_l in PyG)
# ---------------------------------------------------------------------------
def _linear_kernel(x_ref, wl_ref, wr_ref, b_ref, h_ref, s_ref):
    x = x_ref[...]
    h = jnp.dot(x, wl_ref[...], preferred_element_type=jnp.float32)
    s = jnp.dot(x, wr_ref[...], preferred_element_type=jnp.float32) + b_ref[...]
    h_ref[...] = h.astype(h_ref.dtype)
    s_ref[...] = s.astype(s_ref.dtype)


# ---------------------------------------------------------------------------
# Kernel 2: tiled aggregation  out = A @ H + S  (+ optional ReLU)
#   grid = (rows // tm, rows // tk); k (reduction) axis is last / "arbitrary".
# ---------------------------------------------------------------------------
def _aggregate_kernel(a_ref, h_ref, s_ref, o_ref, acc_ref, *, apply_relu):
    k = pl.program_id(1)

    @pl.when(k == 0)
    def _():
        acc_ref[...] = jnp.zeros_like(acc_ref)

    acc_ref[...] += jnp.dot(a_ref[...], h_ref[...],
                            preferred_element_type=jnp.float32)

    @pl.when(k == pl.num_programs(1) - 1)
    def _():
        out = acc_ref[...] + s_ref[...]
        if apply_relu:
            out = jnp.maximum(out, 0.0)
        o_ref[...] = out.astype(o_ref.dtype)


def sage_conv(a, x, w_l, w_r, b, *, apply_relu, out_dtype, tm=256, tk=256):
    """One SAGEConv layer (mean aggr) on padded, lane-aligned inputs.

    a   : [Np, Np]   bf16 row-normalized adjacency (padded, Np % tm == Np % tk == 0)
    x   : [Np, Fin]  bf16 node features (Fin % 128 == 0)
    w_l : [Fin, Fout] bf16,  w_r : [Fin, Fout] bf16,  b : [1, Fout] f32
    """
    n_p = a.shape[0]
    f_in = x.shape[1]
    f_out = w_l.shape[1]
    tm = min(tm, n_p)
    tk = min(tk, n_p)

    # --- kernel 1: H = X @ W_l,  S = X @ W_r + b ---------------------------
    h, s = pl.pallas_call(
        _linear_kernel,
        out_shape=(
            jax.ShapeDtypeStruct((n_p, f_out), jnp.bfloat16),
            jax.ShapeDtypeStruct((n_p, f_out), jnp.float32),
        ),
        grid_spec=pltpu.PrefetchScalarGridSpec(
            num_scalar_prefetch=0,
            grid=(n_p // tm,),
            in_specs=[
                pl.BlockSpec((tm, f_in), lambda i: (i, 0)),
                pl.BlockSpec((f_in, f_out), lambda i: (0, 0)),
                pl.BlockSpec((f_in, f_out), lambda i: (0, 0)),
                pl.BlockSpec((1, f_out), lambda i: (0, 0)),
            ],
            out_specs=[
                pl.BlockSpec((tm, f_out), lambda i: (i, 0)),
                pl.BlockSpec((tm, f_out), lambda i: (i, 0)),
            ],
        ),
        compiler_params=pltpu.CompilerParams(
            dimension_semantics=("parallel",),
            vmem_limit_bytes=VMEM_LIMIT,
        ),
    )(x, w_l, w_r, b)

    # --- kernel 2: out = A @ H + S (+ ReLU) --------------------------------
    kernel = functools.partial(_aggregate_kernel, apply_relu=apply_relu)
    out = pl.pallas_call(
        kernel,
        out_shape=jax.ShapeDtypeStruct((n_p, f_out), out_dtype),
        grid_spec=pltpu.PrefetchScalarGridSpec(
            num_scalar_prefetch=0,
            grid=(n_p // tm, n_p // tk),
            in_specs=[
                pl.BlockSpec((tm, tk), lambda i, k: (i, k)),
                pl.BlockSpec((tk, f_out), lambda i, k: (k, 0)),
                pl.BlockSpec((tm, f_out), lambda i, k: (i, 0)),
            ],
            out_specs=pl.BlockSpec((tm, f_out), lambda i, k: (i, 0)),
            scratch_shapes=[pltpu.VMEM((tm, f_out), jnp.float32)],
        ),
        compiler_params=pltpu.CompilerParams(
            dimension_semantics=("parallel", "arbitrary"),
            vmem_limit_bytes=VMEM_LIMIT,
        ),
    )(a, h, s)
    return out


def edge_index_to_mean_adj(edge_index, num_nodes, num_nodes_padded):
    """Plain-JAX glue: row-normalized adjacency for PyG mean aggregation.

    A[i, j] = 1/deg_in(i) for each edge j -> i; zero-in-degree rows stay zero
    (matches scatter_mean).  Padded rows/cols are zero.
    """
    src, dst = edge_index[0], edge_index[1]
    a = jnp.zeros((num_nodes_padded, num_nodes_padded), jnp.float32)
    a = a.at[dst, src].add(1.0)
    deg = a.sum(axis=1, keepdims=True)
    a = a / jnp.maximum(deg, 1.0)
    return a.astype(jnp.bfloat16)


def sage_forward(params, x, edge_index, *, tm=256, tk=256):
    """Matches SAGE.forward (eval mode): conv -> relu -> dropout -> conv."""
    n, f_in = x.shape
    (w_l1, w_r1, b1), (w_l2, w_r2, b2) = params
    hidden = w_l1.shape[1]
    out_ch = w_l2.shape[1]

    n_p = _round_up(n, max(tm, tk))
    f_in_p = _round_up(f_in, LANE)
    hid_p = _round_up(hidden, LANE)
    out_p = _round_up(out_ch, LANE)

    a = edge_index_to_mean_adj(edge_index, n, n_p)

    x_p = _pad2(x, n_p, f_in_p).astype(jnp.bfloat16)
    wl1 = _pad2(w_l1, f_in_p, hid_p).astype(jnp.bfloat16)
    wr1 = _pad2(w_r1, f_in_p, hid_p).astype(jnp.bfloat16)
    b1p = _pad2(b1, 1, hid_p).astype(jnp.float32)
    wl2 = _pad2(w_l2, hid_p, out_p).astype(jnp.bfloat16)
    wr2 = _pad2(w_r2, hid_p, out_p).astype(jnp.bfloat16)
    b2p = _pad2(b2, 1, out_p).astype(jnp.float32)

    h = sage_conv(a, x_p, wl1, wr1, b1p,
                  apply_relu=True, out_dtype=jnp.bfloat16, tm=tm, tk=tk)
    # TODO(synk): dropout(p=0.5) is identity in eval mode; training-mode RNG
    # dropout is not implemented here.
    out = sage_conv(a, h, wl2, wr2, b2p,
                    apply_relu=False, out_dtype=jnp.float32, tm=tm, tk=tk)
    return out[:n, :out_ch]


def init_params(key, in_channels, hidden_channels, out_channels):
    def glorot(k, shape):
        fan_in, fan_out = shape
        limit = (6.0 / (fan_in + fan_out)) ** 0.5
        return jax.random.uniform(k, shape, jnp.float32, -limit, limit)

    k = jax.random.split(key, 4)
    layer1 = (
        glorot(k[0], (in_channels, hidden_channels)),   # lin_l weight (neighbors)
        glorot(k[1], (in_channels, hidden_channels)),   # lin_r weight (root/self)
        jnp.zeros((1, hidden_channels), jnp.float32),   # lin_l bias
    )
    layer2 = (
        glorot(k[2], (hidden_channels, out_channels)),
        glorot(k[3], (hidden_channels, out_channels)),
        jnp.zeros((1, out_channels), jnp.float32),
    )
    return (layer1, layer2)


def _reference_forward(params, x, edge_index):
    """Pure-JAX f32 reference for correctness checking."""
    n = x.shape[0]
    src, dst = edge_index[0], edge_index[1]
    a = jnp.zeros((n, n), jnp.float32).at[dst, src].add(1.0)
    a = a / jnp.maximum(a.sum(axis=1, keepdims=True), 1.0)
    (w_l1, w_r1, b1), (w_l2, w_r2, b2) = params
    h = jnp.maximum((a @ x) @ w_l1 + x @ w_r1 + b1, 0.0)
    return (a @ h) @ w_l2 + h @ w_r2 + b2


if __name__ == "__main__":
    key = jax.random.PRNGKey(0)
    k_x, k_p, k_e = jax.random.split(key, 3)

    # Small synthetic graph: 64 nodes, 32 input feats, 32 hidden, 16 output.
    num_nodes, in_channels, hidden_channels, out_channels = 64, 32, 32, 16
    num_edges = 256

    x = jax.random.normal(k_x, (num_nodes, in_channels), jnp.float32)
    edge_index = jax.random.randint(
        k_e, (2, num_edges), minval=0, maxval=num_nodes, dtype=jnp.int32
    )
    params = init_params(k_p, in_channels, hidden_channels, out_channels)

    out = sage_forward(params, x, edge_index)
    out = jax.block_until_ready(out)

    assert out.shape == (num_nodes, out_channels)
    assert jnp.all(jnp.isfinite(out))

    # Loose check against the f32 reference (kernel uses bf16 inputs).
    ref = _reference_forward(params, x, edge_index)
    max_err = float(jnp.max(jnp.abs(out - ref)))
    assert max_err < 0.1, f"max abs error {max_err} too large"

    print("KERNEL_OK")
</pallas_src>

<mosaic_0001>
module attributes {stable_mosaic.version = 11 : i64} {
  func.func @_linear_kernel(%arg0: i32, %arg1: memref<256x128xbf16, #tpu.memory_space<vmem>>, %arg2: memref<128x128xbf16, #tpu.memory_space<vmem>>, %arg3: memref<128x128xbf16, #tpu.memory_space<vmem>>, %arg4: memref<1x128xf32, #tpu.memory_space<vmem>>, %arg5: memref<256x128xbf16, #tpu.memory_space<vmem>>, %arg6: memref<256x128xf32, #tpu.memory_space<vmem>>) attributes {dimension_semantics = [#tpu.dimension_semantics<parallel>], iteration_bounds = array<i64: 1>, scalar_prefetch = 0 : i64, scratch_operands = 0 : i64, tpu.core_type = #tpu.core_type<tc>, window_params = [{transform_indices = @transform_0, window_bounds = array<i64: 256, 128>}, {pipeline_mode = #tpu.pipeline_mode<synchronous>, transform_indices = @transform_1, window_bounds = array<i64: 128, 128>}, {pipeline_mode = #tpu.pipeline_mode<synchronous>, transform_indices = @transform_2, window_bounds = array<i64: 128, 128>}, {pipeline_mode = #tpu.pipeline_mode<synchronous>, transform_indices = @transform_3, window_bounds = array<i64: 1, 128>}, {transform_indices = @transform_4, window_bounds = array<i64: 256, 128>}, {transform_indices = @transform_5, window_bounds = array<i64: 256, 128>}]} {
    %c0 = arith.constant 0 : index
    %c0_0 = arith.constant 0 : index
    %0 = vector.load %arg1[%c0, %c0_0] : memref<256x128xbf16, #tpu.memory_space<vmem>>, vector<256x128xbf16>
    %c0_1 = arith.constant 0 : index
    %c0_2 = arith.constant 0 : index
    %1 = vector.load %arg2[%c0_1, %c0_2] : memref<128x128xbf16, #tpu.memory_space<vmem>>, vector<128x128xbf16>
    %cst = arith.constant dense<0.000000e+00> : vector<256x128xf32>
    %2 = tpu.matmul %0, %1, %cst {dimension_numbers = #tpu.dot_dimension_numbers<[1], [0], [0], [1], [0, 0, 1, 1], [], []>} : vector<256x128xbf16>, vector<128x128xbf16>, vector<256x128xf32> -> vector<256x128xf32>
    %c0_3 = arith.constant 0 : index
    %c0_4 = arith.constant 0 : index
    %3 = vector.load %arg3[%c0_3, %c0_4] : memref<128x128xbf16, #tpu.memory_space<vmem>>, vector<128x128xbf16>
    %cst_5 = arith.constant dense<0.000000e+00> : vector<256x128xf32>
    %4 = tpu.matmul %0, %3, %cst_5 {dimension_numbers = #tpu.dot_dimension_numbers<[1], [0], [0], [1], [0, 0, 1, 1], [], []>} : vector<256x128xbf16>, vector<128x128xbf16>, vector<256x128xf32> -> vector<256x128xf32>
    %c0_6 = arith.constant 0 : index
    %c0_7 = arith.constant 0 : index
    %5 = vector.load %arg4[%c0_6, %c0_7] : memref<1x128xf32, #tpu.memory_space<vmem>>, vector<1x128xf32>
    %6 = vector.broadcast %5 : vector<1x128xf32> to vector<256x128xf32>
    %7 = arith.addf %4, %6 : vector<256x128xf32>
    %8 = arith.truncf %2 : vector<256x128xf32> to vector<256x128xbf16>
    %c0_8 = arith.constant 0 : index
    %c0_9 = arith.constant 0 : index
    %9 = vector.load %arg5[%c0_8, %c0_9] : memref<256x128xbf16, #tpu.memory_space<vmem>>, vector<256x128xbf16>
    tpu.vector_store %arg5[%c0_8, %c0_9], %8 {strides = array<i32>} : memref<256x128xbf16, #tpu.memory_space<vmem>>, vector<256x128xbf16>,
    %c0_10 = arith.constant 0 : index
    %c0_11 = arith.constant 0 : index
    %10 = vector.load %arg6[%c0_10, %c0_11] : memref<256x128xf32, #tpu.memory_space<vmem>>, vector<256x128xf32>
    tpu.vector_store %arg6[%c0_10, %c0_11], %7 {strides = array<i32>} : memref<256x128xf32, #tpu.memory_space<vmem>>, vector<256x128xf32>,
    return
  }
  func.func @transform_0(%arg0: i32) -> (i32, i32) {
    %c0_i32 = arith.constant 0 : i32
    %c0_i32_0 = arith.constant 0 : i32
    return %arg0, %c0_i32 : i32, i32
  }
  func.func @transform_1(%arg0: i32) -> (i32, i32) {
    %c0_i32 = arith.constant 0 : i32
    %c0_i32_0 = arith.constant 0 : i32
    %c0_i32_1 = arith.constant 0 : i32
    return %c0_i32, %c0_i32_0 : i32, i32
  }
  func.func @transform_2(%arg0: i32) -> (i32, i32) {
    %c0_i32 = arith.constant 0 : i32
    %c0_i32_0 = arith.constant 0 : i32
    %c0_i32_1 = arith.constant 0 : i32
    return %c0_i32, %c0_i32_0 : i32, i32
  }
  func.func @transform_3(%arg0: i32) -> (i32, i32) {
    %c0_i32 = arith.constant 0 : i32
    %c0_i32_0 = arith.constant 0 : i32
    %c0_i32_1 = arith.constant 0 : i32
    return %c0_i32, %c0_i32_0 : i32, i32
  }
  func.func @transform_4(%arg0: i32) -> (i32, i32) {
    %c0_i32 = arith.constant 0 : i32
    %c0_i32_0 = arith.constant 0 : i32
    return %arg0, %c0_i32 : i32, i32
  }
  func.func @transform_5(%arg0: i32) -> (i32, i32) {
    %c0_i32 = arith.constant 0 : i32
    %c0_i32_0 = arith.constant 0 : i32
    return %arg0, %c0_i32 : i32, i32
  }
}

</mosaic_0001>

<bundles_post_ra>
// kernel: tpu_custom_call.1
= control target key start
LH: loop header
LB: loop body
LE: loop exit
PB: predicated region body
PF: predicated region fallthrough
CT: control target
= control target key end

     0   :  { %11 = vsyncpa [#allocation3], 0  ;;  %s1531_s0 = inlined_call_operand.hbm [shape: bf16[256,128], index: 0, kind: input, shape index: {}]   ;;  %s1532_s1 = inlined_call_operand.hbm [shape: bf16[128,128], index: 1, kind: input, shape index: {}]   ;;  %s1533_s2 = inlined_call_operand.hbm [shape: bf16[128,128], index: 2, kind: input, shape index: {}]   ;;  %s1534_s3 = inlined_call_operand.vmem [shape: f32[1,128], index: 3, kind: input, shape index: {}]   ;;  %s1535_s4 = inlined_call_operand.hbm [shape: bf16[256,128], index: 4, kind: output, shape index: {0}]   ;;  %s1536_s5 = inlined_call_operand.hbm [shape: f32[256,128], index: 5, kind: output, shape index: {1}]  }
   0x1   :  { %12 = vsyncpa [#allocation6], 0 }
   0x2   :  { %13 = vsyncpa [#allocation4], 0 }
   0x3   :  { %14 = vsyncpa [#allocation10], 0  ;;  %s1369_s18 = smov [#allocation5]   ;;  %s1370_s20 = smov [#allocation2]  }
   0x4   :  { %s32_s19 = sshll.u32 %s1369_s18, 4  ;;  %s20_s21 = sshll.u32 %s1370_s20, 4  ;;  %s33_s19 = int_to_ptr.vmem [resolvable:$true] %s32_s19  ;;  %s1408_s21 = int_to_ptr.vmem [resolvable:$true] %s20_s21 }
   0x5   :  { %s1251_s24 = scalar_lea.hbm %s1532_s1, 1024 }
   0x6   :  { %p1252_p0 = scmp.ne.s32.totalorder %s1532_s1, %s1251_s24  ;;  %p1255_p1 = scmp.lt.u32.totalorder %s1251_s24, %s1532_s1 }
   0x8   :  { %p1257_p2 = pnand %p1255_p1, %p1252_p0 }
   0xa   :  { %1260 = shalt.err (!%p1257_p2)
}
   0xb   :  { %s1261_s29 = scalar_lea.vmem %s33_s19, 1024  ;;  %p1266_p4 = scmp.lt.s32.totalorder %s33_s19, %s33_s19 }
   0xc   :  { %p1262_p3 = scmp.ne.s32.totalorder %s33_s19, %s1261_s29  ;;  %p1267_p5 = scmp.lt.s32.totalorder %s1261_s29, %s1261_s29 }
   0xe   :  { %p1268_p6 = por %p1267_p5, %p1266_p4 }
  0x10   :  { %p1269_p7 = pnand %p1268_p6, %p1262_p3 }
  0x12   :  { %1272 = shalt.err (!%p1269_p7)
}
  0x13   :  { %s1371_s30 = smov 64   ;;  %s1372_s6 = smov 4  }
  0x14   :  { %38 = dma.hbm_to_vmem [thread:$0]  %s1532_s1, 1024, %s33_s19, [#allocation6], %s1371_s30, %s1371_s30, %s1372_s6  }
  0x15   :  { %s1273_s11 = scalar_lea.hbm %s1531_s0, 2048 }
  0x16   :  { %p1274_p8 = scmp.ne.s32.totalorder %s1531_s0, %s1273_s11  ;;  %p1277_p9 = scmp.lt.u32.totalorder %s1273_s11, %s1531_s0 }
  0x18   :  { %p1279_p10 = pnand %p1277_p9, %p1274_p8 }
  0x1a   :  { %1282 = shalt.err (!%p1279_p10)
}
  0x1b   :  { %s1283_s16 = scalar_lea.vmem %s1408_s21, 2048  ;;  %p1288_p12 = scmp.lt.s32.totalorder %s1408_s21, %s1408_s21 }
  0x1c   :  { %p1284_p11 = scmp.ne.s32.totalorder %s1408_s21, %s1283_s16  ;;  %p1289_p13 = scmp.lt.s32.totalorder %s1283_s16, %s1283_s16 }
  0x1e   :  { %p1290_p0 = por %p1289_p13, %p1288_p12 }
  0x20   :  { %p1291_p1 = pnand %p1290_p0, %p1284_p11 }
  0x22   :  { %1294 = shalt.err (!%p1291_p1)
}
  0x23   :  { %26 = dma.hbm_to_vmem [thread:$0]  %s1531_s0, 2048, %s1408_s21, [#allocation3], %s1371_s30, %s1371_s30, %s1372_s6  }
  0x24   :  { %s1373_s18 = smov [#allocation7]   ;;  %s1295_s23 = scalar_lea.hbm %s1533_s2, 1024 }
  0x25   :  { %s44_s19 = sshll.u32 %s1373_s18, 4  ;;  %p1296_p2 = scmp.ne.s32.totalorder %s1533_s2, %s1295_s23  ;;  %s45_s19 = int_to_ptr.vmem [resolvable:$true] %s44_s19 }
  0x26   :  { %p1299_p3 = scmp.lt.u32.totalorder %s1295_s23, %s1533_s2 }
  0x28   :  { %p1301_p4 = pnand %p1299_p3, %p1296_p2 }
  0x2a   :  { %1304 = shalt.err (!%p1301_p4)
}
  0x2b   :  { %s1305_s28 = scalar_lea.vmem %s45_s19, 1024  ;;  %p1310_p6 = scmp.lt.s32.totalorder %s45_s19, %s45_s19 }
  0x2c   :  { %p1306_p5 = scmp.ne.s32.totalorder %s45_s19, %s1305_s28  ;;  %p1311_p7 = scmp.lt.s32.totalorder %s1305_s28, %s1305_s28 }
  0x2e   :  { %p1312_p8 = por %p1311_p7, %p1310_p6 }
  0x30   :  { %p1313_p9 = pnand %p1312_p8, %p1306_p5 }
  0x32   :  { %1316 = shalt.err (!%p1313_p9)
}
  0x33   :  { %50 = dma.hbm_to_vmem [thread:$0]  %s1533_s2, 1024, %s45_s19, [#allocation6], %s1371_s30, %s1371_s30, %s1372_s6  }
  0x34   :  { %1361 = dma.done.wait [#allocation3], 2048  }
  0x35   :  { %1362 = vsyncadd [#allocation3], 4294965248 }
  0x36   :  { %1363 = dma.done.wait [#allocation6], 2048  }
  0x37   :  { %1364 = vsyncadd [#allocation6], 4294965248  ;;  %v1219_v0 = vld [vmem:[#allocation5] sm:$0xff]   ;;  %v1221_v2 = vld [vmem:[#allocation5 + $0x8] sm:$0xff]   ;;  %s1375_s8 = smov [#allocation9]  }
  0x38   :  { %v1220_v1 = vld [vmem:[#allocation7] sm:$0xff]   ;;  %1114 = vmatprep.subr.bf16.mxu0 %v1219_v0  ;;  %v1222_v3 = vld [vmem:[#allocation7 + $0x8] sm:$0xff]   ;;  %v1223_v4 = vld [vmem:[#allocation5 + $0x10] sm:$0xff]   ;;  %s857_s9 = sshll.u32 %s1375_s8, 4  ;;  %s1496_s9 = int_to_ptr.vmem [resolvable:$true] %s857_s9 }
  0x39   :  { %1162 = vmatprep.subr.bf16.mxu1 %v1220_v1  ;;  %1115 = vmatpush3.bf16.msra.mxu0 %v1219_v0  ;;  %v1224_v5 = vld [vmem:[#allocation7 + $0x10] sm:$0xff]   ;;  %v1225_v6 = vld [vmem:[#allocation5 + $0x18] sm:$0xff]   ;;  %v1227_v8 = vld [vmem:[#allocation5 + $0x20] sm:$0xff]  }
  0x3a   :  { %1163 = vmatpush3.bf16.msra.mxu1 %v1220_v1  ;;  %1116 = vmatprep.subr.bf16.mxu0 %v1221_v2  ;;  %v1226_v7 = vld [vmem:[#allocation7 + $0x18] sm:$0xff]   ;;  %v1228_v9 = vld [vmem:[#allocation7 + $0x20] sm:$0xff]   ;;  %v1229_v10 = vld [vmem:[#allocation5 + $0x28] sm:$0xff]  }
  0x3b   :  { %1164 = vmatprep.subr.bf16.mxu1 %v1222_v3  ;;  %v1235_v11 = vld [vmem:[#allocation2] sm:$0xff]   ;;  %v1230_v12 = vld [vmem:[#allocation7 + $0x28] sm:$0xff]   ;;  %v1231_v13 = vld [vmem:[#allocation5 + $0x30] sm:$0xff]  }
  0x3c   :  { %1130 = vmatprep.mubr.bf16.mxu0 %v1235_v11  ;;  %1178 = vmatprep.mubr.bf16.mxu1 %v1235_v11  ;;  %v1232_v14 = vld [vmem:[#allocation7 + $0x30] sm:$0xff]   ;;  %v1233_v15 = vld [vmem:[#allocation5 + $0x38] sm:$0xff]   ;;  %v1236_v17 = vld [vmem:[#allocation2 + $0x8] sm:$0xff]  }
  0x3d   :  { %1117 = vmatpush3.bf16.msra.mxu0 %v1221_v2  ;;  %v1234_v16 = vld [vmem:[#allocation7 + $0x38] sm:$0xff]   ;;  %v1237_v18 = vld [vmem:[#allocation2 + $0x10] sm:$0xff]   ;;  %v1239_v20 = vld [vmem:[#allocation2 + $0x20] sm:$0xff]  }
  0x3e   :  { %1165 = vmatpush3.bf16.msra.mxu1 %v1222_v3  ;;  %1118 = vmatprep.subr.bf16.mxu0 %v1223_v4  ;;  %v1238_v19 = vld [vmem:[#allocation2 + $0x18] sm:$0xff]   ;;  %v1240_v21 = vld [vmem:[#allocation2 + $0x28] sm:$0xff]   ;;  %v1241_v22 = vld [vmem:[#allocation2 + $0x30] sm:$0xff]  }
  0x3f   :  { %1166 = vmatprep.subr.bf16.mxu1 %v1224_v5  ;;  %v1242_v23 = vld [vmem:[#allocation2 + $0x38] sm:$0xff]   ;;  %v1243_v24 = vld [vmem:[#allocation2 + $0x40] sm:$0xff]   ;;  %v1244_v25 = vld [vmem:[#allocation2 + $0x48] sm:$0xff]  }
  0x40   :  { %v1245_v26 = vld [vmem:[#allocation2 + $0x50] sm:$0xff]   ;;  %v1246_v27 = vld [vmem:[#allocation2 + $0x58] sm:$0xff]   ;;  %v1247_v28 = vld [vmem:[#allocation2 + $0x60] sm:$0xff]  }
  0x41   :  { %1119 = vmatpush3.bf16.msra.mxu0 %v1223_v4  ;;  %v1248_v29 = vld [vmem:[#allocation2 + $0x68] sm:$0xff]   ;;  %v1249_v30 = vld [vmem:[#allocation2 + $0x70] sm:$0xff]   ;;  %v1250_v31 = vld [vmem:[#allocation2 + $0x78] sm:$0xff]  }
  0x42   :  { %1167 = vmatpush3.bf16.msra.mxu1 %v1224_v5  ;;  %1120 = vmatprep.subr.bf16.mxu0 %v1225_v6  ;;  %v1463_v32 = vld [vmem:[%s1534_s3] ss:$0 sm:$0xff]  ;;  %s1374_s3 = smov [#allocation8]  }
  0x43   :  { %1168 = vmatprep.subr.bf16.mxu1 %v1226_v7  ;;  %s845_s7 = sshll.u32 %s1374_s3, 4  ;;  %s846_s7 = int_to_ptr.vmem [resolvable:$true] %s845_s7 }
  0x44   :  { %s1317_s10 = scalar_lea.vmem %s846_s7, 2048  ;;  %p1322_p11 = scmp.lt.s32.totalorder %s846_s7, %s846_s7 }
  0x45   :  { %1121 = vmatpush3.bf16.msra.mxu0 %v1225_v6  ;;  %p1318_p10 = scmp.ne.s32.totalorder %s846_s7, %s1317_s10  ;;  %p1323_p12 = scmp.lt.s32.totalorder %s1317_s10, %s1317_s10 }
  0x46   :  { %1169 = vmatpush3.bf16.msra.mxu1 %v1226_v7  ;;  %1122 = vmatprep.subr.bf16.mxu0 %v1227_v8 }
  0x47   :  { %1170 = vmatprep.subr.bf16.mxu1 %v1228_v9  ;;  %p1324_p13 = por %p1323_p12, %p1322_p11 }
  0x49   :  { %1123 = vmatpush3.bf16.msra.mxu0 %v1227_v8  ;;  %p1325_p0 = pnand %p1324_p13, %p1318_p10 }
  0x4a   :  { %1171 = vmatpush3.bf16.msra.mxu1 %v1228_v9  ;;  %1124 = vmatprep.subr.bf16.mxu0 %v1229_v10 }
  0x4b   :  { %1172 = vmatprep.subr.bf16.mxu1 %v1230_v12 }
  0x4d   :  { %1125 = vmatpush3.bf16.msra.mxu0 %v1229_v10 }
  0x4e   :  { %1173 = vmatpush3.bf16.msra.mxu1 %v1230_v12  ;;  %1126 = vmatprep.subr.bf16.mxu0 %v1231_v13 }
  0x4f   :  { %1174 = vmatprep.subr.bf16.mxu1 %v1232_v14 }
  0x51   :  { %1127 = vmatpush3.bf16.msra.mxu0 %v1231_v13 }
  0x52   :  { %1175 = vmatpush3.bf16.msra.mxu1 %v1232_v14  ;;  %1128 = vmatprep.subr.bf16.mxu0 %v1233_v15 }
  0x53   :  { %1176 = vmatprep.subr.bf16.mxu1 %v1234_v16 }
  0x55   :  { %1129 = vmatpush3.bf16.msra.mxu0 %v1233_v15 }
  0x56   :  { %1177 = vmatpush3.bf16.msra.mxu1 %v1234_v16 }
  0x58   :  { %1131 = vmatmul.mubr.bf16.vlgmr.msra.gmra.mrb[0].mxu0 %v1236_v17 }
  0x59   :  { %1179 = vmatmul.mubr.bf16.vlgmr.msra.gmra.mrb[0].mxu1 %v1236_v17  ;;  %1134 = vmatprep.mubr.bf16.mxu0 %v1237_v18 }
  0x5a   :  { %1182 = vmatprep.mubr.bf16.mxu1 %v1237_v18 }
  0x60   :  { %1135 = vmatmul.mubr.bf16.gmra.mrb[4].mxu0 %v1238_v19 }
  0x61   :  { %1183 = vmatmul.mubr.bf16.gmra.mrb[4].mxu1 %v1238_v19  ;;  %1138 = vmatprep.mubr.bf16.mxu0 %v1239_v20 }
  0x62   :  { %1186 = vmatprep.mubr.bf16.mxu1 %v1239_v20 }
  0x68   :  { %1139 = vmatmul.mubr.bf16.gmra.mrb[8].mxu0 %v1240_v21 }
  0x69   :  { %1187 = vmatmul.mubr.bf16.gmra.mrb[8].mxu1 %v1240_v21  ;;  %1142 = vmatprep.mubr.bf16.mxu0 %v1241_v22 }
  0x6a   :  { %1190 = vmatprep.mubr.bf16.mxu1 %v1241_v22 }
  0x70   :  { %1143 = vmatmul.mubr.bf16.gmra.mrb[12].mxu0 %v1242_v23 }
  0x71   :  { %1191 = vmatmul.mubr.bf16.gmra.mrb[12].mxu1 %v1242_v23  ;;  %1146 = vmatprep.mubr.bf16.mxu0 %v1243_v24 }
  0x72   :  { %1194 = vmatprep.mubr.bf16.mxu1 %v1243_v24 }
  0x78   :  { %1147 = vmatmul.mubr.bf16.gmra.mrb[16].mxu0 %v1244_v25 }
  0x79   :  { %1195 = vmatmul.mubr.bf16.gmra.mrb[16].mxu1 %v1244_v25  ;;  %1150 = vmatprep.mubr.bf16.mxu0 %v1245_v26 }
  0x7a   :  { %1198 = vmatprep.mubr.bf16.mxu1 %v1245_v26 }
  0x80   :  { %1151 = vmatmul.mubr.bf16.gmra.mrb[20].mxu0 %v1246_v27 }
  0x81   :  { %1199 = vmatmul.mubr.bf16.gmra.mrb[20].mxu1 %v1246_v27  ;;  %1154 = vmatprep.mubr.bf16.mxu0 %v1247_v28 }
  0x82   :  { %1202 = vmatprep.mubr.bf16.mxu1 %v1247_v28 }
  0x88   :  { %1155 = vmatmul.mubr.bf16.gmra.mrb[24].mxu0 %v1248_v29 }
  0x89   :  { %1203 = vmatmul.mubr.bf16.gmra.mrb[24].mxu1 %v1248_v29  ;;  %1158 = vmatprep.mubr.bf16.mxu0 %v1249_v30 }
  0x8a   :  { %1206 = vmatprep.mubr.bf16.mxu1 %v1249_v30 }
  0x90   :  { %1159 = vmatmul.mubr.bf16.gmra.mrb[28].mxu0 %v1250_v31 }
  0x91   :  { %1207 = vmatmul.mubr.bf16.gmra.mrb[28].mxu1 %v1250_v31 }
 0x12b   :  { %v1132_v33 = vpop.f32.mrb[0].mxu0 }
 0x12c   :  { %v1180_v34 = vpop.f32.mrb[0].mxu1  ;;  %v289_v35 = vpop.f32.mrb[1].mxu0 }
 0x12d   :  { %v530_v36 = vadd.f32 %v1180_v34, %v1463_v32  ;;  %v521_v37 = vpop.f32.mrb[1].mxu1  ;;  %v1133_v38 = vpop.f32.mrb[2].mxu0 }
 0x12e   :  { %v522_v39 = vadd.f32 %v1463_v32, %v521_v37  ;;  %v979_v40 = vpack.c.bf16 %v1133_v38, %v1132_v33  ;;  %v1181_v41 = vpop.f32.mrb[2].mxu1  ;;  %v292_v42 = vpop.f32.mrb[3].mxu0 }
 0x12f   :  { %810 = vst [vmem:[#allocation9 + $0x10] sm:$0xff] %v530_v36  ;;  %v533_v43 = vadd.f32 %v1181_v41, %v1463_v32  ;;  %v974_v44 = vpack.c.bf16 %v292_v42, %v289_v35  ;;  %v524_v45 = vpop.f32.mrb[3].mxu1 }
 0x130   :  { %808 = vst [vmem:[#allocation9] sm:$0xff] %v522_v39  ;;  %1051 = vst [vmem:[#allocation8 + $0x8] sm:$0xff] %v979_v40   ;;  %v525_v46 = vadd.f32 %v1463_v32, %v524_v45 }
 0x131   :  { %811 = vst [vmem:[#allocation9 + $0x18] sm:$0xff] %v533_v43  ;;  %975 = vst [vmem:[#allocation8] sm:$0xff] %v974_v44  }
 0x132   :  { %809 = vst [vmem:[#allocation9 + $0x8] sm:$0xff] %v525_v46 }
 0x133   :  { %v1136_v47 = vpop.f32.mrb[4].mxu0 }
 0x134   :  { %v1184_v48 = vpop.f32.mrb[4].mxu1  ;;  %v305_v49 = vpop.f32.mrb[5].mxu0 }
 0x135   :  { %v546_v50 = vadd.f32 %v1184_v48, %v1463_v32  ;;  %v537_v51 = vpop.f32.mrb[5].mxu1  ;;  %v1137_v52 = vpop.f32.mrb[6].mxu0 }
 0x136   :  { %v538_v53 = vadd.f32 %v1463_v32, %v537_v51  ;;  %v989_v54 = vpack.c.bf16 %v1137_v52, %v1136_v47  ;;  %v1185_v55 = vpop.f32.mrb[6].mxu1  ;;  %v308_v56 = vpop.f32.mrb[7].mxu0 }
 0x137   :  { %814 = vst [vmem:[#allocation9 + $0x30] sm:$0xff] %v546_v50  ;;  %v549_v57 = vadd.f32 %v1185_v55, %v1463_v32  ;;  %v984_v58 = vpack.c.bf16 %v308_v56, %v305_v49  ;;  %v540_v59 = vpop.f32.mrb[7].mxu1 }
 0x138   :  { %812 = vst [vmem:[#allocation9 + $0x20] sm:$0xff] %v538_v53  ;;  %1053 = vst [vmem:[#allocation8 + $0x18] sm:$0xff] %v989_v54   ;;  %v541_v60 = vadd.f32 %v1463_v32, %v540_v59 }
 0x139   :  { %815 = vst [vmem:[#allocation9 + $0x38] sm:$0xff] %v549_v57  ;;  %1052 = vst [vmem:[#allocation8 + $0x10] sm:$0xff] %v984_v58  }
 0x13a   :  { %813 = vst [vmem:[#allocation9 + $0x28] sm:$0xff] %v541_v60 }
 0x13b   :  { %v1140_v61 = vpop.f32.mrb[8].mxu0 }
 0x13c   :  { %v1188_v62 = vpop.f32.mrb[8].mxu1  ;;  %v321_v63 = vpop.f32.mrb[9].mxu0 }
 0x13d   :  { %v562_v0 = vadd.f32 %v1188_v62, %v1463_v32  ;;  %v553_v1 = vpop.f32.mrb[9].mxu1  ;;  %v1141_v2 = vpop.f32.mrb[10].mxu0 }
 0x13e   :  { %v554_v3 = vadd.f32 %v1463_v32, %v553_v1  ;;  %v999_v4 = vpack.c.bf16 %v1141_v2, %v1140_v61  ;;  %v1189_v5 = vpop.f32.mrb[10].mxu1  ;;  %v324_v6 = vpop.f32.mrb[11].mxu0 }
 0x13f   :  { %818 = vst [vmem:[#allocation9 + $0x50] sm:$0xff] %v562_v0  ;;  %v565_v7 = vadd.f32 %v1189_v5, %v1463_v32  ;;  %v994_v8 = vpack.c.bf16 %v324_v6, %v321_v63  ;;  %v556_v9 = vpop.f32.mrb[11].mxu1 }
 0x140   :  { %816 = vst [vmem:[#allocation9 + $0x40] sm:$0xff] %v554_v3  ;;  %1055 = vst [vmem:[#allocation8 + $0x28] sm:$0xff] %v999_v4   ;;  %v557_v10 = vadd.f32 %v1463_v32, %v556_v9 }
 0x141   :  { %819 = vst [vmem:[#allocation9 + $0x58] sm:$0xff] %v565_v7  ;;  %1054 = vst [vmem:[#allocation8 + $0x20] sm:$0xff] %v994_v8  }
 0x142   :  { %817 = vst [vmem:[#allocation9 + $0x48] sm:$0xff] %v557_v10 }
 0x143   :  { %v1144_v11 = vpop.f32.mrb[12].mxu0 }
 0x144   :  { %v1192_v12 = vpop.f32.mrb[12].mxu1  ;;  %v337_v13 = vpop.f32.mrb[13].mxu0 }
 0x145   :  { %v578_v14 = vadd.f32 %v1192_v12, %v1463_v32  ;;  %v569_v15 = vpop.f32.mrb[13].mxu1  ;;  %v1145_v16 = vpop.f32.mrb[14].mxu0 }
 0x146   :  { %v570_v17 = vadd.f32 %v1463_v32, %v569_v15  ;;  %v1009_v18 = vpack.c.bf16 %v1145_v16, %v1144_v11  ;;  %v1193_v19 = vpop.f32.mrb[14].mxu1  ;;  %v340_v20 = vpop.f32.mrb[15].mxu0 }
 0x147   :  { %822 = vst [vmem:[#allocation9 + $0x70] sm:$0xff] %v578_v14  ;;  %v581_v21 = vadd.f32 %v1193_v19, %v1463_v32  ;;  %v1004_v22 = vpack.c.bf16 %v340_v20, %v337_v13  ;;  %v572_v23 = vpop.f32.mrb[15].mxu1 }
 0x148   :  { %820 = vst [vmem:[#allocation9 + $0x60] sm:$0xff] %v570_v17  ;;  %1057 = vst [vmem:[#allocation8 + $0x38] sm:$0xff] %v1009_v18   ;;  %v573_v24 = vadd.f32 %v1463_v32, %v572_v23 }
 0x149   :  { %823 = vst [vmem:[#allocation9 + $0x78] sm:$0xff] %v581_v21  ;;  %1056 = vst [vmem:[#allocation8 + $0x30] sm:$0xff] %v1004_v22  }
 0x14a   :  { %821 = vst [vmem:[#allocation9 + $0x68] sm:$0xff] %v573_v24 }
 0x14b   :  { %v1148_v25 = vpop.f32.mrb[16].mxu0 }
 0x14c   :  { %v1196_v26 = vpop.f32.mrb[16].mxu1  ;;  %v353_v27 = vpop.f32.mrb[17].mxu0 }
 0x14d   :  { %v594_v28 = vadd.f32 %v1196_v26, %v1463_v32  ;;  %v585_v29 = vpop.f32.mrb[17].mxu1  ;;  %v1149_v30 = vpop.f32.mrb[18].mxu0 }
 0x14e   :  { %v586_v31 = vadd.f32 %v1463_v32, %v585_v29  ;;  %v1019_v33 = vpack.c.bf16 %v1149_v30, %v1148_v25  ;;  %v1197_v34 = vpop.f32.mrb[18].mxu1  ;;  %v356_v35 = vpop.f32.mrb[19].mxu0 }
 0x14f   :  { %826 = vst [vmem:[#allocation9 + $0x90] sm:$0xff] %v594_v28  ;;  %v597_v36 = vadd.f32 %v1197_v34, %v1463_v32  ;;  %v1014_v37 = vpack.c.bf16 %v356_v35, %v353_v27  ;;  %v588_v38 = vpop.f32.mrb[19].mxu1 }
 0x150   :  { %824 = vst [vmem:[#allocation9 + $0x80] sm:$0xff] %v586_v31  ;;  %1059 = vst [vmem:[#allocation8 + $0x48] sm:$0xff] %v1019_v33   ;;  %v589_v39 = vadd.f32 %v1463_v32, %v588_v38 }
 0x151   :  { %827 = vst [vmem:[#allocation9 + $0x98] sm:$0xff] %v597_v36  ;;  %1058 = vst [vmem:[#allocation8 + $0x40] sm:$0xff] %v1014_v37  }
 0x152   :  { %825 = vst [vmem:[#allocation9 + $0x88] sm:$0xff] %v589_v39 }
 0x153   :  { %v1152_v40 = vpop.f32.mrb[20].mxu0 }
 0x154   :  { %v1200_v41 = vpop.f32.mrb[20].mxu1  ;;  %v369_v42 = vpop.f32.mrb[21].mxu0 }
 0x155   :  { %v610_v43 = vadd.f32 %v1200_v41, %v1463_v32  ;;  %v601_v44 = vpop.f32.mrb[21].mxu1  ;;  %v1153_v45 = vpop.f32.mrb[22].mxu0 }
 0x156   :  { %v602_v46 = vadd.f32 %v1463_v32, %v601_v44  ;;  %v1029_v47 = vpack.c.bf16 %v1153_v45, %v1152_v40  ;;  %v1201_v48 = vpop.f32.mrb[22].mxu1  ;;  %v372_v49 = vpop.f32.mrb[23].mxu0 }
 0x157   :  { %830 = vst [vmem:[#allocation9 + $0xb0] sm:$0xff] %v610_v43  ;;  %v613_v50 = vadd.f32 %v1201_v48, %v1463_v32  ;;  %v1024_v51 = vpack.c.bf16 %v372_v49, %v369_v42  ;;  %v604_v52 = vpop.f32.mrb[23].mxu1 }
 0x158   :  { %828 = vst [vmem:[#allocation9 + $0xa0] sm:$0xff] %v602_v46  ;;  %1061 = vst [vmem:[#allocation8 + $0x58] sm:$0xff] %v1029_v47   ;;  %v605_v53 = vadd.f32 %v1463_v32, %v604_v52 }
 0x159   :  { %831 = vst [vmem:[#allocation9 + $0xb8] sm:$0xff] %v613_v50  ;;  %1060 = vst [vmem:[#allocation8 + $0x50] sm:$0xff] %v1024_v51  }
 0x15a   :  { %829 = vst [vmem:[#allocation9 + $0xa8] sm:$0xff] %v605_v53 }
 0x15b   :  { %v1156_v54 = vpop.f32.mrb[24].mxu0 }
 0x15c   :  { %v1204_v55 = vpop.f32.mrb[24].mxu1  ;;  %v385_v56 = vpop.f32.mrb[25].mxu0 }
 0x15d   :  { %v626_v57 = vadd.f32 %v1204_v55, %v1463_v32  ;;  %v617_v58 = vpop.f32.mrb[25].mxu1  ;;  %v1157_v59 = vpop.f32.mrb[26].mxu0 }
 0x15e   :  { %v618_v60 = vadd.f32 %v1463_v32, %v617_v58  ;;  %v1039_v61 = vpack.c.bf16 %v1157_v59, %v1156_v54  ;;  %v1205_v62 = vpop.f32.mrb[26].mxu1  ;;  %v388_v63 = vpop.f32.mrb[27].mxu0 }
 0x15f   :  { %834 = vst [vmem:[#allocation9 + $0xd0] sm:$0xff] %v626_v57  ;;  %v629_v0 = vadd.f32 %v1205_v62, %v1463_v32  ;;  %v1034_v1 = vpack.c.bf16 %v388_v63, %v385_v56  ;;  %v620_v2 = vpop.f32.mrb[27].mxu1 }
 0x160   :  { %832 = vst [vmem:[#allocation9 + $0xc0] sm:$0xff] %v618_v60  ;;  %1063 = vst [vmem:[#allocation8 + $0x68] sm:$0xff] %v1039_v61   ;;  %v621_v3 = vadd.f32 %v1463_v32, %v620_v2 }
 0x161   :  { %835 = vst [vmem:[#allocation9 + $0xd8] sm:$0xff] %v629_v0  ;;  %1062 = vst [vmem:[#allocation8 + $0x60] sm:$0xff] %v1034_v1  }
 0x162   :  { %833 = vst [vmem:[#allocation9 + $0xc8] sm:$0xff] %v621_v3 }
 0x163   :  { %v1160_v4 = vpop.f32.mrb[28].mxu0 }
 0x164   :  { %v1208_v5 = vpop.f32.mrb[28].mxu1  ;;  %v401_v6 = vpop.f32.mrb[29].mxu0 }
 0x165   :  { %v642_v7 = vadd.f32 %v1208_v5, %v1463_v32  ;;  %v633_v8 = vpop.f32.mrb[29].mxu1  ;;  %v1161_v9 = vpop.f32.mrb[30].mxu0 }
 0x166   :  { %v634_v10 = vadd.f32 %v1463_v32, %v633_v8  ;;  %v1049_v11 = vpack.c.bf16 %v1161_v9, %v1160_v4  ;;  %v1209_v12 = vpop.f32.mrb[30].mxu1  ;;  %v404_v13 = vpop.f32.mrb[31].mxu0 }
 0x167   :  { %838 = vst [vmem:[#allocation9 + $0xf0] sm:$0xff] %v642_v7  ;;  %v645_v14 = vadd.f32 %v1209_v12, %v1463_v32  ;;  %v1044_v15 = vpack.c.bf16 %v404_v13, %v401_v6  ;;  %v636_v16 = vpop.f32.mrb[31].mxu1 }
 0x168   :  { %836 = vst [vmem:[#allocation9 + $0xe0] sm:$0xff] %v634_v10  ;;  %1065 = vst [vmem:[#allocation8 + $0x78] sm:$0xff] %v1049_v11   ;;  %v637_v17 = vadd.f32 %v1463_v32, %v636_v16 }
 0x169   :  { %839 = vst [vmem:[#allocation9 + $0xf8] sm:$0xff] %v645_v14  ;;  %1064 = vst [vmem:[#allocation8 + $0x70] sm:$0xff] %v1044_v15  }
 0x16a   :  { %837 = vst [vmem:[#allocation9 + $0xe8] sm:$0xff] %v637_v17 }
 0x16b   :  { %1328 = shalt.err (!%p1325_p0)
}
 0x16c   :  { %s1329_s13 = scalar_lea.hbm %s1535_s4, 2048 }
 0x16d   :  { %p1330_p1 = scmp.ne.s32.totalorder %s1535_s4, %s1329_s13  ;;  %p1333_p2 = scmp.lt.u32.totalorder %s1329_s13, %s1535_s4 }
 0x16f   :  { %p1335_p3 = pnand %p1333_p2, %p1330_p1 }
 0x171   :  { %1338 = shalt.err (!%p1335_p3)
}
 0x172   :  { %851 = dma.vmem_to_hbm [thread:$0]  %s846_s7, 2048, %s1535_s4, [#allocation4], %s1371_s30, %s1371_s30, %s1372_s6  }
 0x173   :  { %s1339_s19 = scalar_lea.vmem %s1496_s9, 4096  ;;  %p1344_p5 = scmp.lt.s32.totalorder %s1496_s9, %s1496_s9 }
 0x174   :  { %p1340_p4 = scmp.ne.s32.totalorder %s1496_s9, %s1339_s19  ;;  %p1345_p6 = scmp.lt.s32.totalorder %s1339_s19, %s1339_s19 }
 0x176   :  { %p1346_p7 = por %p1345_p6, %p1344_p5 }
 0x178   :  { %p1347_p8 = pnand %p1346_p7, %p1340_p4 }
 0x17a   :  { %1350 = shalt.err (!%p1347_p8)
}
 0x17b   :  { %s1351_s23 = scalar_lea.hbm %s1536_s5, 4096 }
 0x17c   :  { %p1352_p9 = scmp.ne.s32.totalorder %s1536_s5, %s1351_s23  ;;  %p1355_p10 = scmp.lt.u32.totalorder %s1351_s23, %s1536_s5 }
 0x17e   :  { %p1357_p11 = pnand %p1355_p10, %p1352_p9 }
 0x180   :  { %1360 = shalt.err (!%p1357_p11)
}
 0x181   :  { %s1376_s4 = smov 128   ;;  %s1377_s30 = smov 8  }
 0x182   :  { %863 = dma.vmem_to_hbm [thread:$0]  %s1496_s9, 4096, %s1536_s5, [#allocation10], %s1376_s4, %s1376_s4, %s1377_s30  }
 0x183   :  { %1365 = dma.done.wait [#allocation4], 2048  }
 0x184   :  { %1366 = vsyncadd [#allocation4], 4294965248 }
 0x185   :  { %1367 = dma.done.wait [#allocation10], 4096  }
 0x186   :  { %1368 = vsyncadd [#allocation10], 4294963200 }
 0x187   :  { %870 = vsyncpa [#allocation3], 1 }
 0x188   :  { %871 = vsyncpa [#allocation6], 1 }
 0x189   :  { %872 = vsyncpa [#allocation4], 1 }
 0x18a   :  { %873 = vsyncpa [#allocation10], 1 }

</bundles_post_ra>
